<compile_context>
chip_gen: v6e
topology: v6e:2x2x1
jax: 0.10.0
libtpu: 0.0.40
codegen_flags: <defaults>
</compile_context>

<pallas_src>
import functools
import math

import jax
import jax.numpy as jnp
from jax.experimental import pallas as pl
from jax.experimental.pallas import tpu as pltpu


# ---------------------------------------------------------------------------
# Pallas kernels
# ---------------------------------------------------------------------------
def gcn_fused_kernel(a_ref, xw1_ref, b1_ref, w2_ref, b2_ref, o_ref):
    """Both GCN layers with A_hat fully VMEM-resident (single grid step)."""
    a = a_ref[...]
    # Layer 1: h = relu(A @ (X W1) + b1), f32 accumulation.
    h = jnp.dot(a, xw1_ref[...], preferred_element_type=jnp.float32)
    h = jnp.maximum(h + b1_ref[...], 0.0)
    # Row-local projection to output channels: z = h @ W2.
    z = jnp.dot(h.astype(jnp.bfloat16), w2_ref[...],
                preferred_element_type=jnp.float32)
    # Layer 2 aggregation: out = A @ z + b2.
    out = jnp.dot(a, z.astype(jnp.bfloat16),
                  preferred_element_type=jnp.float32)
    o_ref[...] = (out + b2_ref[...]).astype(o_ref.dtype)


def gcn_phase1_kernel(a_ref, xw1_ref, b1_ref, w2_ref, z_ref, acc_ref):
    """K-tiled: acc += A_blk @ XW1_blk; finalize z = relu(acc + b1) @ W2."""
    k = pl.program_id(1)

    @pl.when(k == 0)
    def _():
        acc_ref[...] = jnp.zeros_like(acc_ref)

    acc_ref[...] += jnp.dot(a_ref[...], xw1_ref[...],
                            preferred_element_type=jnp.float32)

    @pl.when(k == pl.num_programs(1) - 1)
    def _():
        h = jnp.maximum(acc_ref[...] + b1_ref[...], 0.0)
        z = jnp.dot(h.astype(jnp.bfloat16), w2_ref[...],
                    preferred_element_type=jnp.float32)
        z_ref[...] = z.astype(z_ref.dtype)


def gcn_phase2_kernel(a_ref, z_ref, b2_ref, o_ref, acc_ref):
    """K-tiled: acc += A_blk @ z_blk; finalize out = acc + b2."""
    k = pl.program_id(1)

    @pl.when(k == 0)
    def _():
        acc_ref[...] = jnp.zeros_like(acc_ref)

    acc_ref[...] += jnp.dot(a_ref[...], z_ref[...],
                            preferred_element_type=jnp.float32)

    @pl.when(k == pl.num_programs(1) - 1)
    def _():
        o_ref[...] = (acc_ref[...] + b2_ref[...]).astype(o_ref.dtype)


# ---------------------------------------------------------------------------
# Wrapper
# ---------------------------------------------------------------------------
def _round_up(x, m):
    return ((x + m - 1) // m) * m


def _pad_to(arr, shape, dtype):
    pads = [(0, s - d) for d, s in zip(arr.shape, shape)]
    return jnp.pad(arr, pads).astype(dtype)


# bf16 A_hat <= 8 MiB -> comfortably VMEM-resident on all generations.
_FUSED_MAX_NPAD = 2048


@functools.partial(jax.jit, static_argnames=("tm", "tk", "force_tiled"))
def gnn_forward(a_hat, x, w1, b1, w2, b2, *, tm=256, tk=512, force_tiled=False):
    n, _ = x.shape
    h_dim = w1.shape[1]
    c_dim = w2.shape[1]

    h_pad = _round_up(h_dim, 128)
    c_pad = _round_up(c_dim, 128)

    # Precompute XW1 = X @ W1 in f32 (tiny (N,F)@(F,H) XLA op); the kernels
    # only ever see the already-projected, lane-padded features.
    xw1 = x.astype(jnp.float32) @ w1.astype(jnp.float32)

    use_fused = (not force_tiled) and (_round_up(n, 128) <= _FUSED_MAX_NPAD)

    if use_fused:
        n_pad = _round_up(n, 128)
    else:
        assert tm % 128 == 0 and tk % 128 == 0, "tm/tk must be multiples of 128"
        n_pad = _round_up(n, math.lcm(tm, tk))

    # bf16 matmul operands (halves the dominant A_hat HBM/VMEM traffic);
    # biases stay f32 for the f32 epilogue.
    a_p = _pad_to(a_hat, (n_pad, n_pad), jnp.bfloat16)
    xw1_p = _pad_to(xw1, (n_pad, h_pad), jnp.bfloat16)
    b1_p = _pad_to(b1, (1, h_pad), jnp.float32)
    w2_p = _pad_to(w2, (h_pad, c_pad), jnp.bfloat16)
    b2_p = _pad_to(b2, (1, c_pad), jnp.float32)

    if use_fused:
        # Size the scoped-VMEM request to the real footprint (x2 for Pallas
        # buffering + slack); never request a full v7x core's 64 MiB.
        resident = (2 * n_pad * n_pad          # A bf16
                    + 2 * n_pad * h_pad        # XW1 bf16
                    + 2 * h_pad * c_pad        # W2 bf16
                    + 4 * (h_pad + c_pad)      # biases f32
                    + 4 * n_pad * c_pad)       # out f32
        vmem_limit = int(min(48 << 20, max(16 << 20, 2 * resident + (4 << 20))))

        out = pl.pallas_call(
            gcn_fused_kernel,
            out_shape=jax.ShapeDtypeStruct((n_pad, c_pad), jnp.float32),
            grid=(1,),
            in_specs=[
                pl.BlockSpec((n_pad, n_pad), lambda i: (0, 0)),    # A_hat
                pl.BlockSpec((n_pad, h_pad), lambda i: (0, 0)),    # X @ W1
                pl.BlockSpec((1, h_pad), lambda i: (0, 0)),        # b1
                pl.BlockSpec((h_pad, c_pad), lambda i: (0, 0)),    # W2
                pl.BlockSpec((1, c_pad), lambda i: (0, 0)),        # b2
            ],
            out_specs=pl.BlockSpec((n_pad, c_pad), lambda i: (0, 0)),
            compiler_params=pltpu.CompilerParams(
                dimension_semantics=("arbitrary",),
                vmem_limit_bytes=vmem_limit,
            ),
        )(a_p, xw1_p, b1_p, w2_p, b2_p)
        return out[:n, :c_dim]

    # --------- large-N path: row tiles x reduction tiles, bounded VMEM -------
    grid = (n_pad // tm, n_pad // tk)
    cparams = pltpu.CompilerParams(
        dimension_semantics=("parallel", "arbitrary"))

    # Phase 1: z = relu(A @ XW1 + b1) @ W2  (row-tiled, K-tiled aggregation)
    z = pl.pallas_call(
        gcn_phase1_kernel,
        out_shape=jax.ShapeDtypeStruct((n_pad, c_pad), jnp.bfloat16),
        grid=grid,
        in_specs=[
            pl.BlockSpec((tm, tk), lambda i, k: (i, k)),        # A block
            pl.BlockSpec((tk, h_pad), lambda i, k: (k, 0)),     # XW1 slab
            pl.BlockSpec((1, h_pad), lambda i, k: (0, 0)),      # b1
            pl.BlockSpec((h_pad, c_pad), lambda i, k: (0, 0)),  # W2
        ],
        out_specs=pl.BlockSpec((tm, c_pad), lambda i, k: (i, 0)),
        scratch_shapes=[pltpu.VMEM((tm, h_pad), jnp.float32)],
        compiler_params=cparams,
    )(a_p, xw1_p, b1_p, w2_p)

    # Phase 2: out = A @ z + b2  (row-tiled, K-tiled aggregation)
    out = pl.pallas_call(
        gcn_phase2_kernel,
        out_shape=jax.ShapeDtypeStruct((n_pad, c_pad), jnp.float32),
        grid=grid,
        in_specs=[
            pl.BlockSpec((tm, tk), lambda i, k: (i, k)),        # A block
            pl.BlockSpec((tk, c_pad), lambda i, k: (k, 0)),     # z slab
            pl.BlockSpec((1, c_pad), lambda i, k: (0, 0)),      # b2
        ],
        out_specs=pl.BlockSpec((tm, c_pad), lambda i, k: (i, 0)),
        scratch_shapes=[pltpu.VMEM((tm, c_pad), jnp.float32)],
        compiler_params=cparams,
    )(a_p, z, b2_p)

    return out[:n, :c_dim]


# ---------------------------------------------------------------------------
# Glue: dense normalized adjacency from edge_index (PyG gcn_norm semantics)
# ---------------------------------------------------------------------------
def normalized_adjacency(edge_index, num_nodes):
    src, dst = edge_index[0], edge_index[1]
    a = jnp.zeros((num_nodes, num_nodes), jnp.float32).at[dst, src].add(1.0)
    a = a + jnp.eye(num_nodes, dtype=jnp.float32)            # self-loops
    deg = a.sum(axis=1)
    d_inv_sqrt = jnp.where(deg > 0, 1.0 / jnp.sqrt(deg), 0.0)
    return d_inv_sqrt[:, None] * a * d_inv_sqrt[None, :]


def glorot(key, fan_in, fan_out):
    limit = jnp.sqrt(6.0 / (fan_in + fan_out))
    return jax.random.uniform(key, (fan_in, fan_out), jnp.float32, -limit, limit)


if __name__ == "__main__":
    num_nodes = 256
    num_node_features = 4
    hidden_channels = 16
    output_channels = 2

    key = jax.random.PRNGKey(0)
    k_x, k_w1, k_w2, k_b1, k_b2 = jax.random.split(key, 5)

    # Node features
    x = jax.random.normal(k_x, (num_nodes, num_node_features), jnp.float32)

    # Deterministic small graph: ring edges in both directions
    src = jnp.arange(num_nodes, dtype=jnp.int32)
    dst = (src + 1) % num_nodes
    edge_index = jnp.stack(
        [jnp.concatenate([src, dst]), jnp.concatenate([dst, src])], axis=0)

    # Parameters (GCNConv: lin weight [in, out], bias [out])
    w1 = glorot(k_w1, num_node_features, hidden_channels)
    b1 = 0.1 * jax.random.normal(k_b1, (1, hidden_channels), jnp.float32)
    w2 = glorot(k_w2, hidden_channels, output_channels)
    b2 = 0.1 * jax.random.normal(k_b2, (1, output_channels), jnp.float32)

    a_hat = normalized_adjacency(edge_index, num_nodes)

    # Pure f32 JAX reference (kernel uses bf16 operands with f32 accumulation,
    # so compare with a loose tolerance).
    ref_h = jnp.maximum(a_hat @ (x @ w1) + b1, 0.0)
    ref = a_hat @ (ref_h @ w2) + b2

    # Fused fast path (A_hat VMEM-resident, single pallas_call) — used here.
    out = gnn_forward(a_hat, x, w1, b1, w2, b2)
    jax.block_until_ready(out)
    assert out.shape == (num_nodes, output_channels)
    assert jnp.allclose(out, ref, atol=3e-2, rtol=3e-2), (
        float(jnp.max(jnp.abs(out - ref))))

    # Large-N tiled path (row x reduction tiling, bounded VMEM), forced here
    # so both code paths are validated.
    out_tiled = gnn_forward(a_hat, x, w1, b1, w2, b2, force_tiled=True)
    jax.block_until_ready(out_tiled)
    assert out_tiled.shape == (num_nodes, output_channels)
    assert jnp.allclose(out_tiled, ref, atol=3e-2, rtol=3e-2), (
        float(jnp.max(jnp.abs(out_tiled - ref))))

    print("KERNEL_OK")
</pallas_src>

<mosaic_0001>
module attributes {stable_mosaic.version = 11 : i64} {
  func.func @gcn_fused_kernel(%arg0: i32, %arg1: memref<256x256xbf16, #tpu.memory_space<vmem>>, %arg2: memref<256x128xbf16, #tpu.memory_space<vmem>>, %arg3: memref<1x128xf32, #tpu.memory_space<vmem>>, %arg4: memref<128x128xbf16, #tpu.memory_space<vmem>>, %arg5: memref<1x128xf32, #tpu.memory_space<vmem>>, %arg6: memref<256x128xf32, #tpu.memory_space<vmem>>) attributes {dimension_semantics = [#tpu.dimension_semantics<arbitrary>], iteration_bounds = array<i64: 1>, scalar_prefetch = 0 : i64, scratch_operands = 0 : i64, tpu.core_type = #tpu.core_type<tc>, window_params = [{pipeline_mode = #tpu.pipeline_mode<synchronous>, transform_indices = @transform_0, window_bounds = array<i64: 256, 256>}, {pipeline_mode = #tpu.pipeline_mode<synchronous>, transform_indices = @transform_1, window_bounds = array<i64: 256, 128>}, {pipeline_mode = #tpu.pipeline_mode<synchronous>, transform_indices = @transform_2, window_bounds = array<i64: 1, 128>}, {pipeline_mode = #tpu.pipeline_mode<synchronous>, transform_indices = @transform_3, window_bounds = array<i64: 128, 128>}, {pipeline_mode = #tpu.pipeline_mode<synchronous>, transform_indices = @transform_4, window_bounds = array<i64: 1, 128>}, {pipeline_mode = #tpu.pipeline_mode<synchronous>, transform_indices = @transform_5, window_bounds = array<i64: 256, 128>}]} {
    %c0 = arith.constant 0 : index
    %c0_0 = arith.constant 0 : index
    %0 = vector.load %arg1[%c0, %c0_0] : memref<256x256xbf16, #tpu.memory_space<vmem>>, vector<256x256xbf16>
    %c0_1 = arith.constant 0 : index
    %c0_2 = arith.constant 0 : index
    %1 = vector.load %arg2[%c0_1, %c0_2] : memref<256x128xbf16, #tpu.memory_space<vmem>>, vector<256x128xbf16>
    %cst = arith.constant dense<0.000000e+00> : vector<256x128xf32>
    %2 = tpu.matmul %0, %1, %cst {dimension_numbers = #tpu.dot_dimension_numbers<[1], [0], [0], [1], [0, 0, 1, 1], [], []>} : vector<256x256xbf16>, vector<256x128xbf16>, vector<256x128xf32> -> vector<256x128xf32>
    %c0_3 = arith.constant 0 : index
    %c0_4 = arith.constant 0 : index
    %3 = vector.load %arg3[%c0_3, %c0_4] : memref<1x128xf32, #tpu.memory_space<vmem>>, vector<1x128xf32>
    %4 = vector.broadcast %3 : vector<1x128xf32> to vector<256x128xf32>
    %5 = arith.addf %2, %4 : vector<256x128xf32>
    %cst_5 = arith.constant 0.000000e+00 : f32
    %6 = vector.broadcast %cst_5 : f32 to vector<256x128xf32>
    %7 = arith.maximumf %5, %6 : vector<256x128xf32>
    %8 = arith.truncf %7 : vector<256x128xf32> to vector<256x128xbf16>
    %c0_6 = arith.constant 0 : index
    %c0_7 = arith.constant 0 : index
    %9 = vector.load %arg4[%c0_6, %c0_7] : memref<128x128xbf16, #tpu.memory_space<vmem>>, vector<128x128xbf16>
    %cst_8 = arith.constant dense<0.000000e+00> : vector<256x128xf32>
    %10 = tpu.matmul %8, %9, %cst_8 {dimension_numbers = #tpu.dot_dimension_numbers<[1], [0], [0], [1], [0, 0, 1, 1], [], []>} : vector<256x128xbf16>, vector<128x128xbf16>, vector<256x128xf32> -> vector<256x128xf32>
    %11 = arith.truncf %10 : vector<256x128xf32> to vector<256x128xbf16>
    %cst_9 = arith.constant dense<0.000000e+00> : vector<256x128xf32>
    %12 = tpu.matmul %0, %11, %cst_9 {dimension_numbers = #tpu.dot_dimension_numbers<[1], [0], [0], [1], [0, 0, 1, 1], [], []>} : vector<256x256xbf16>, vector<256x128xbf16>, vector<256x128xf32> -> vector<256x128xf32>
    %c0_10 = arith.constant 0 : index
    %c0_11 = arith.constant 0 : index
    %13 = vector.load %arg5[%c0_10, %c0_11] : memref<1x128xf32, #tpu.memory_space<vmem>>, vector<1x128xf32>
    %14 = vector.broadcast %13 : vector<1x128xf32> to vector<256x128xf32>
    %15 = arith.addf %12, %14 : vector<256x128xf32>
    %c0_12 = arith.constant 0 : index
    %c0_13 = arith.constant 0 : index
    %16 = vector.load %arg6[%c0_12, %c0_13] : memref<256x128xf32, #tpu.memory_space<vmem>>, vector<256x128xf32>
    tpu.vector_store %arg6[%c0_12, %c0_13], %15 {strides = array<i32>} : memref<256x128xf32, #tpu.memory_space<vmem>>, vector<256x128xf32>,
    return
  }
  func.func @transform_0(%arg0: i32) -> (i32, i32) {
    %c0_i32 = arith.constant 0 : i32
    %c0_i32_0 = arith.constant 0 : i32
    %c0_i32_1 = arith.constant 0 : i32
    return %c0_i32, %c0_i32_0 : i32, i32
  }
  func.func @transform_1(%arg0: i32) -> (i32, i32) {
    %c0_i32 = arith.constant 0 : i32
    %c0_i32_0 = arith.constant 0 : i32
    %c0_i32_1 = arith.constant 0 : i32
    return %c0_i32, %c0_i32_0 : i32, i32
  }
  func.func @transform_2(%arg0: i32) -> (i32, i32) {
    %c0_i32 = arith.constant 0 : i32
    %c0_i32_0 = arith.constant 0 : i32
    %c0_i32_1 = arith.constant 0 : i32
    return %c0_i32, %c0_i32_0 : i32, i32
  }
  func.func @transform_3(%arg0: i32) -> (i32, i32) {
    %c0_i32 = arith.constant 0 : i32
    %c0_i32_0 = arith.constant 0 : i32
    %c0_i32_1 = arith.constant 0 : i32
    return %c0_i32, %c0_i32_0 : i32, i32
  }
  func.func @transform_4(%arg0: i32) -> (i32, i32) {
    %c0_i32 = arith.constant 0 : i32
    %c0_i32_0 = arith.constant 0 : i32
    %c0_i32_1 = arith.constant 0 : i32
    return %c0_i32, %c0_i32_0 : i32, i32
  }
  func.func @transform_5(%arg0: i32) -> (i32, i32) {
    %c0_i32 = arith.constant 0 : i32
    %c0_i32_0 = arith.constant 0 : i32
    %c0_i32_1 = arith.constant 0 : i32
    return %c0_i32, %c0_i32_0 : i32, i32
  }
}

</mosaic_0001>

<bundles_post_ra>
// kernel: gnn_forward.1
= control target key start
LH: loop header
LB: loop body
LE: loop exit
PB: predicated region body
PF: predicated region fallthrough
CT: control target
= control target key end

     0   :  { %s1940_s1 = inlined_call_operand.vmem [shape: bf16[256,128], index: 1, kind: input, shape index: {}]   ;;  %s1941_s0 = inlined_call_operand.vmem [shape: bf16[256,256], index: 0, kind: input, shape index: {}]   ;;  %s1942_s3 = inlined_call_operand.vmem [shape: bf16[128,128], index: 3, kind: input, shape index: {}]   ;;  %s1943_s2 = inlined_call_operand.vmem [shape: f32[1,128], index: 2, kind: input, shape index: {}]   ;;  %s1944_s4 = inlined_call_operand.vmem [shape: f32[1,128], index: 4, kind: input, shape index: {}]   ;;  %s1945_s5 = inlined_call_operand.vmem [shape: f32[256,128], index: 5, kind: output, shape index: {}]  }
   0x1   :  { %v1372_v0 = vld [vmem:[%s1940_s1 + $0x78] sm:$0xff]   ;;  %v1374_v2 = vld [vmem:[%s1940_s1 + $0x70] sm:$0xff]   ;;  %v1376_v4 = vld [vmem:[%s1940_s1 + $0x68] sm:$0xff]  }
   0x2   :  { %v1373_v1 = vld [vmem:[%s1940_s1 + $0x38] sm:$0xff]   ;;  %1060 = vmatprep.subr.bf16.mxu0 %v1372_v0  ;;  %v1375_v3 = vld [vmem:[%s1940_s1 + $0x30] sm:$0xff]   ;;  %v1377_v5 = vld [vmem:[%s1940_s1 + $0x28] sm:$0xff]  }
   0x3   :  { %1061 = vmatpush3.bf16.msra.mxu0 %v1373_v1  ;;  %v1378_v6 = vld [vmem:[%s1940_s1 + $0x60] sm:$0xff]   ;;  %v1380_v8 = vld [vmem:[%s1940_s1 + $0x58] sm:$0xff]   ;;  %v1382_v10 = vld [vmem:[%s1940_s1 + $0x50] sm:$0xff]  }
   0x4   :  { %1062 = vmatprep.subr.bf16.mxu0 %v1374_v2  ;;  %v1379_v7 = vld [vmem:[%s1940_s1 + $0x20] sm:$0xff]   ;;  %v1381_v9 = vld [vmem:[%s1940_s1 + $0x18] sm:$0xff]   ;;  %v1383_v12 = vld [vmem:[%s1940_s1 + $0x10] sm:$0xff]  }
   0x5   :  { %v1510_v11 = vld [vmem:[%s1941_s0 + $0x4] ss:$8 sps:$4 sm:$0xff]   ;;  %v1531_v17 = vld [vmem:[%s1941_s0] ss:$8 sps:$4 sm:$0xff]   ;;  %v1536_v18 = vld [vmem:[%s1941_s0 + $0x14] ss:$8 sps:$4 sm:$0xff]  }
   0x6   :  { %380 = vmatprep.mubr.bf16.mxu0 %v1510_v11  ;;  %v1384_v13 = vld [vmem:[%s1940_s1 + $0x48] sm:$0xff]   ;;  %v1386_v15 = vld [vmem:[%s1940_s1 + $0x40] sm:$0xff]   ;;  %v1543_v19 = vld [vmem:[%s1941_s0 + $0x10] ss:$8 sps:$4 sm:$0xff]  }
   0x7   :  { %1063 = vmatpush3.bf16.msra.mxu0 %v1375_v3  ;;  %v1385_v14 = vld [vmem:[%s1940_s1 + $0x8] sm:$0xff]   ;;  %v1387_v16 = vld [vmem:[%s1940_s1] sm:$0xff]   ;;  %v1436_v21 = vld [vmem:[%s1942_s3 + $0x38] sm:$0xff]  }
   0x8   :  { %1064 = vmatprep.subr.bf16.mxu0 %v1376_v4  ;;  %v1548_v20 = vld [vmem:[%s1941_s0 + $0x24] ss:$8 sps:$4 sm:$0xff]   ;;  %v1437_v22 = vld [vmem:[%s1942_s3 + $0x30] sm:$0xff]   ;;  %1356 = vmatprep.subr.bf16.mxu1 %v1436_v21  ;;  %v1564_v24 = vld [vmem:[%s1941_s0 + $0x20] ss:$8 sps:$4 sm:$0xff]  }
   0x9   :  { %v1438_v23 = vld [vmem:[%s1942_s3 + $0x28] sm:$0xff]   ;;  %1364 = vmatpush3.bf16.msra.mxu1 %v1436_v21  ;;  %v1569_v25 = vld [vmem:[%s1941_s0 + $0x34] ss:$8 sps:$4 sm:$0xff]   ;;  %v1576_v26 = vld [vmem:[%s1941_s0 + $0x30] ss:$8 sps:$4 sm:$0xff]  }
   0xa   :  { %1357 = vmatprep.subr.bf16.mxu1 %v1437_v22  ;;  %v1581_v27 = vld [vmem:[%s1941_s0 + $0x44] ss:$8 sps:$4 sm:$0xff]   ;;  %v1588_v28 = vld [vmem:[%s1941_s0 + $0x40] ss:$8 sps:$4 sm:$0xff]   ;;  %v1593_v29 = vld [vmem:[%s1941_s0 + $0x54] ss:$8 sps:$4 sm:$0xff]  }
   0xb   :  { %1065 = vmatpush3.bf16.msra.mxu0 %v1377_v5  ;;  %v1600_v30 = vld [vmem:[%s1941_s0 + $0x50] ss:$8 sps:$4 sm:$0xff]   ;;  %v1605_v31 = vld [vmem:[%s1941_s0 + $0x64] ss:$8 sps:$4 sm:$0xff]   ;;  %v1612_v32 = vld [vmem:[%s1941_s0 + $0x60] ss:$8 sps:$4 sm:$0xff]  }
   0xc   :  { %1066 = vmatprep.subr.bf16.mxu0 %v1378_v6  ;;  %v1617_v33 = vld [vmem:[%s1941_s0 + $0x74] ss:$8 sps:$4 sm:$0xff]   ;;  %v1624_v34 = vld [vmem:[%s1941_s0 + $0x70] ss:$8 sps:$4 sm:$0xff]   ;;  %v1629_v35 = vld [vmem:[%s1941_s0 + $0x84] ss:$8 sps:$4 sm:$0xff]  }
   0xd   :  { %1365 = vmatpush3.bf16.msra.mxu1 %v1437_v22  ;;  %v1636_v36 = vld [vmem:[%s1941_s0 + $0x80] ss:$8 sps:$4 sm:$0xff]   ;;  %v1641_v37 = vld [vmem:[%s1941_s0 + $0x94] ss:$8 sps:$4 sm:$0xff]   ;;  %v1651_v39 = vld [vmem:[%s1941_s0 + $0x90] ss:$8 sps:$4 sm:$0xff]  }
   0xe   :  { %1358 = vmatprep.subr.bf16.mxu1 %v1438_v23  ;;  %v1439_v38 = vld [vmem:[%s1942_s3 + $0x20] sm:$0xff]   ;;  %v1440_v41 = vld [vmem:[%s1942_s3 + $0x18] sm:$0xff]   ;;  %v1441_v42 = vld [vmem:[%s1942_s3 + $0x10] sm:$0xff]  }
   0xf   :  { %1067 = vmatpush3.bf16.msra.mxu0 %v1379_v7  ;;  %v1656_v40 = vld [vmem:[%s1941_s0 + $0xa4] ss:$8 sps:$4 sm:$0xff]   ;;  %v1669_v43 = vld [vmem:[%s1941_s0 + $0xa0] ss:$8 sps:$4 sm:$0xff]   ;;  %v1674_v44 = vld [vmem:[%s1941_s0 + $0xb4] ss:$8 sps:$4 sm:$0xff]  }
  0x10   :  { %1068 = vmatprep.subr.bf16.mxu0 %v1380_v8  ;;  %v1442_v45 = vld [vmem:[%s1942_s3 + $0x8] sm:$0xff]   ;;  %v1443_v46 = vld [vmem:[%s1942_s3] sm:$0xff]   ;;  %v1687_v47 = vld [vmem:[%s1941_s0 + $0xb0] ss:$8 sps:$4 sm:$0xff]  }
  0x11   :  { %1366 = vmatpush3.bf16.msra.mxu1 %v1438_v23  ;;  %v1692_v48 = vld [vmem:[%s1941_s0 + $0xc4] ss:$8 sps:$4 sm:$0xff]   ;;  %v1699_v49 = vld [vmem:[%s1941_s0 + $0xc0] ss:$8 sps:$4 sm:$0xff]   ;;  %v1704_v50 = vld [vmem:[%s1941_s0 + $0xd4] ss:$8 sps:$4 sm:$0xff]  }
  0x12   :  { %1359 = vmatprep.subr.bf16.mxu1 %v1439_v38  ;;  %1954 = vst [vmem:[#allocation2_spill] sm:$0xff] %v1692_v48  ;;  %1955 = vst [vmem:[#allocation3_spill] sm:$0xff] %v1699_v49  ;;  %v1711_v51 = vld [vmem:[%s1941_s0 + $0xd0] ss:$8 sps:$4 sm:$0xff]   ;;  %v1716_v52 = vld [vmem:[%s1941_s0 + $0xe4] ss:$8 sps:$4 sm:$0xff]  }
  0x13   :  { %1069 = vmatpush3.bf16.msra.mxu0 %v1381_v9  ;;  %1956 = vst [vmem:[#allocation4_spill] sm:$0xff] %v1704_v50  ;;  %1957 = vst [vmem:[#allocation5_spill] sm:$0xff] %v1711_v51  ;;  %v1723_v53 = vld [vmem:[%s1941_s0 + $0xe0] ss:$8 sps:$4 sm:$0xff]   ;;  %v1728_v54 = vld [vmem:[%s1941_s0 + $0xf4] ss:$8 sps:$4 sm:$0xff]  }
  0x14   :  { %1070 = vmatprep.subr.bf16.mxu0 %v1382_v10  ;;  %1958 = vst [vmem:[#allocation6_spill] sm:$0xff] %v1716_v52  ;;  %1959 = vst [vmem:[#allocation7_spill] sm:$0xff] %v1723_v53  ;;  %v1735_v55 = vld [vmem:[%s1941_s0 + $0xf0] ss:$8 sps:$4 sm:$0xff]   ;;  %v1741_v59 = vld [vmem:[%s1943_s2] ss:$0 sm:$0xff] }
  0x15   :  { %1367 = vmatpush3.bf16.msra.mxu1 %v1439_v38  ;;  %1960 = vst [vmem:[#allocation8_spill] sm:$0xff] %v1728_v54  ;;  %1961 = vst [vmem:[#allocation9_spill] sm:$0xff] %v1735_v55 }
  0x16   :  { %1360 = vmatprep.subr.bf16.mxu1 %v1440_v41 }
  0x17   :  { %1071 = vmatpush3.bf16.msra.mxu0 %v1383_v12 }
  0x18   :  { %1072 = vmatprep.subr.bf16.mxu0 %v1384_v13 }
  0x19   :  { %1368 = vmatpush3.bf16.msra.mxu1 %v1440_v41 }
  0x1a   :  { %1361 = vmatprep.subr.bf16.mxu1 %v1441_v42 }
  0x1b   :  { %1073 = vmatpush3.bf16.msra.mxu0 %v1385_v14 }
  0x1c   :  { %1074 = vmatprep.subr.bf16.mxu0 %v1386_v15 }
  0x1d   :  { %1369 = vmatpush3.bf16.msra.mxu1 %v1441_v42 }
  0x1e   :  { %1362 = vmatprep.subr.bf16.mxu1 %v1442_v45 }
  0x1f   :  { %1075 = vmatpush3.bf16.msra.mxu0 %v1387_v16 }
  0x20   :  { %1308 = vmatprep.subr.bf16.mxu0 %v1436_v21 }
  0x21   :  { %1370 = vmatpush3.bf16.msra.mxu1 %v1442_v45 }
  0x22   :  { %381 = vmatmul.mubr.bf16.vlgmr.msra.gmra.mxu0 %v1531_v17  ;;  %1363 = vmatprep.subr.bf16.mxu1 %v1443_v46 }
  0x23   :  { %388 = vmatprep.mubr.bf16.mxu0 %v1536_v18  ;;  %1309 = vmatpush3.bf16.msra.mxu0 %v1436_v21 }
  0x24   :  { %1310 = vmatprep.subr.bf16.mxu0 %v1437_v22 }
  0x25   :  { %1371 = vmatpush3.bf16.msra.mxu1 %v1443_v46 }
  0x27   :  { %1311 = vmatpush3.bf16.msra.mxu0 %v1437_v22 }
  0x28   :  { %1312 = vmatprep.subr.bf16.mxu0 %v1438_v23 }
  0x2a   :  { %389 = vmatmul.mubr.bf16.gmra.mxu0 %v1543_v19 }
  0x2b   :  { %396 = vmatprep.mubr.bf16.mxu0 %v1548_v20  ;;  %1313 = vmatpush3.bf16.msra.mxu0 %v1438_v23 }
  0x2c   :  { %1314 = vmatprep.subr.bf16.mxu0 %v1439_v38 }
  0x2f   :  { %1315 = vmatpush3.bf16.msra.mxu0 %v1439_v38 }
  0x30   :  { %1316 = vmatprep.subr.bf16.mxu0 %v1440_v41 }
  0x32   :  { %397 = vmatmul.mubr.bf16.gmra.mxu0 %v1564_v24 }
  0x33   :  { %404 = vmatprep.mubr.bf16.mxu0 %v1569_v25  ;;  %1317 = vmatpush3.bf16.msra.mxu0 %v1440_v41 }
  0x34   :  { %1318 = vmatprep.subr.bf16.mxu0 %v1441_v42 }
  0x37   :  { %1319 = vmatpush3.bf16.msra.mxu0 %v1441_v42 }
  0x38   :  { %1320 = vmatprep.subr.bf16.mxu0 %v1442_v45 }
  0x3a   :  { %405 = vmatmul.mubr.bf16.gmra.mxu0 %v1576_v26 }
  0x3b   :  { %412 = vmatprep.mubr.bf16.mxu0 %v1581_v27  ;;  %1321 = vmatpush3.bf16.msra.mxu0 %v1442_v45 }
  0x3c   :  { %1322 = vmatprep.subr.bf16.mxu0 %v1443_v46 }
  0x3f   :  { %1323 = vmatpush3.bf16.msra.mxu0 %v1443_v46 }
  0x42   :  { %413 = vmatmul.mubr.bf16.gmra.mxu0 %v1588_v28 }
  0x43   :  { %420 = vmatprep.mubr.bf16.mxu0 %v1593_v29 }
  0x4a   :  { %421 = vmatmul.mubr.bf16.gmra.mxu0 %v1600_v30 }
  0x4b   :  { %428 = vmatprep.mubr.bf16.mxu0 %v1605_v31 }
  0x52   :  { %429 = vmatmul.mubr.bf16.gmra.mxu0 %v1612_v32 }
  0x53   :  { %436 = vmatprep.mubr.bf16.mxu0 %v1617_v33 }
  0x5a   :  { %437 = vmatmul.mubr.bf16.gmra.mxu0 %v1624_v34 }
  0x5b   :  { %444 = vmatprep.mubr.bf16.mxu0 %v1629_v35 }
  0x62   :  { %445 = vmatmul.mubr.bf16.gmra.mxu0 %v1636_v36 }
  0x63   :  { %452 = vmatprep.mubr.bf16.mxu0 %v1641_v37 }
  0x6a   :  { %453 = vmatmul.mubr.bf16.gmra.mxu0 %v1651_v39 }
  0x6b   :  { %460 = vmatprep.mubr.bf16.mxu0 %v1656_v40 }
  0x72   :  { %461 = vmatmul.mubr.bf16.gmra.mxu0 %v1669_v43 }
  0x73   :  { %468 = vmatprep.mubr.bf16.mxu0 %v1674_v44 }
  0x7a   :  { %469 = vmatmul.mubr.bf16.gmra.mxu0 %v1687_v47 }
  0x7b   :  { %476 = vmatprep.mubr.bf16.mxu0 %v1692_v48 }
  0x82   :  { %477 = vmatmul.mubr.bf16.gmra.mxu0 %v1699_v49 }
  0x83   :  { %484 = vmatprep.mubr.bf16.mxu0 %v1704_v50 }
  0x8a   :  { %485 = vmatmul.mubr.bf16.gmra.mxu0 %v1711_v51 }
  0x8b   :  { %492 = vmatprep.mubr.bf16.mxu0 %v1716_v52 }
  0x92   :  { %493 = vmatmul.mubr.bf16.gmra.mxu0 %v1723_v53 }
  0x93   :  { %500 = vmatprep.mubr.bf16.mxu0 %v1728_v54 }
  0x9a   :  { %501 = vmatmul.mubr.bf16.gmra.mxu0 %v1735_v55 }
  0xe2   :  { %v1076_v56 = vpop.f32.mrf.mxu0 }
  0xe4   :  { %v1077_v57 = vpop.f32.mrf.mxu0 }
  0xe5   :  { %v1078_v58 = vadd.f32 %v1077_v57, %v1076_v56 }
  0xe6   :  { %v1079_v60 = vpop.f32.mrf.mxu0 }
  0xe7   :  { %v383_v62 = vadd.f32 %v1078_v58, %v1741_v59 }
  0xe8   :  { %v1080_v61 = vpop.f32.mrf.mxu0 }
  0xe9   :  { %v1081_v63 = vadd.f32 %v1080_v61, %v1079_v60  ;;  %v509_v3 = vmax.f32 %v383_v62, 0.0 }
  0xea   :  { %v1082_v0 = vpop.f32.mrf.mxu0 }
  0xeb   :  { %v386_v1 = vadd.f32 %v1081_v63, %v1741_v59 }
  0xec   :  { %v1083_v2 = vpop.f32.mrf.mxu0 }
  0xed   :  { %v510_v4 = vmax.f32 %v386_v1, 0.0  ;;  %v1084_v5 = vadd.f32 %v1083_v2, %v1082_v0 }
  0xee   :  { %v1085_v6 = vpop.f32.mrf.mxu0 }
  0xef   :  { %v541_v7 = vpack.c.bf16 %v510_v4, %v509_v3  ;;  %v391_v9 = vadd.f32 %v1084_v5, %v1741_v59 }
  0xf0   :  { %v1086_v8 = vpop.f32.mrf.mxu0 }
  0xf1   :  { %v1087_v10 = vadd.f32 %v1086_v8, %v1085_v6  ;;  %1324 = vmatprep.mubr.bf16.mxu0 %v541_v7  ;;  %v511_v15 = vmax.f32 %v391_v9, 0.0 }
  0xf2   :  { %v1088_v12 = vpop.f32.mrf.mxu0 }
  0xf3   :  { %v394_v13 = vadd.f32 %v1087_v10, %v1741_v59 }
  0xf4   :  { %v1089_v14 = vpop.f32.mrf.mxu0 }
  0xf5   :  { %v512_v16 = vmax.f32 %v394_v13, 0.0  ;;  %v1090_v21 = vadd.f32 %v1089_v14, %v1088_v12 }
  0xf6   :  { %v1091_v22 = vpop.f32.mrf.mxu0 }
  0xf7   :  { %v542_v23 = vpack.c.bf16 %v512_v16, %v511_v15  ;;  %v399_v41 = vadd.f32 %v1090_v21, %v1741_v59 }
  0xf8   :  { %v1092_v38 = vpop.f32.mrf.mxu0 }
  0xf9   :  { %v1093_v42 = vadd.f32 %v1092_v38, %v1091_v22  ;;  %1325 = vmatmul.mubr.bf16.vlgmr.msra.gmra.mxu0 %v542_v23  ;;  %v513_v57 = vmax.f32 %v399_v41, 0.0 }
  0xfa   :  { %v1094_v45 = vpop.f32.mrf.mxu0 }
  0xfb   :  { %v402_v46 = vadd.f32 %v1093_v42, %v1741_v59 }
  0xfc   :  { %v1095_v56 = vpop.f32.mrf.mxu0 }
  0xfd   :  { %v514_v58 = vmax.f32 %v402_v46, 0.0  ;;  %v1096_v60 = vadd.f32 %v1095_v56, %v1094_v45 }
  0xfe   :  { %v1097_v61 = vpop.f32.mrf.mxu0 }
  0xff   :  { %v543_v62 = vpack.c.bf16 %v514_v58, %v513_v57  ;;  %v407_v0 = vadd.f32 %v1096_v60, %v1741_v59 }
 0x100   :  { %v1098_v63 = vpop.f32.mrf.mxu0 }
 0x101   :  { %v1099_v1 = vadd.f32 %v1098_v63, %v1097_v61  ;;  %1328 = vmatprep.mubr.bf16.mxu0 %v543_v62  ;;  %v515_v5 = vmax.f32 %v407_v0, 0.0 }
 0x102   :  { %v1100_v2 = vpop.f32.mrf.mxu0 }
 0x103   :  { %v410_v3 = vadd.f32 %v1099_v1, %v1741_v59 }
 0x104   :  { %v1101_v4 = vpop.f32.mrf.mxu0 }
 0x105   :  { %v516_v6 = vmax.f32 %v410_v3, 0.0  ;;  %v1102_v7 = vadd.f32 %v1101_v4, %v1100_v2 }
 0x106   :  { %v1103_v8 = vpop.f32.mrf.mxu0 }
 0x107   :  { %v544_v9 = vpack.c.bf16 %v516_v6, %v515_v5  ;;  %v415_v12 = vadd.f32 %v1102_v7, %v1741_v59 }
 0x108   :  { %v1104_v10 = vpop.f32.mrf.mxu0 }
 0x109   :  { %v1105_v13 = vadd.f32 %v1104_v10, %v1103_v8  ;;  %1329 = vmatmul.mubr.bf16.gmra.mxu0 %v544_v9  ;;  %v517_v21 = vmax.f32 %v415_v12, 0.0 }
 0x10a   :  { %v1106_v14 = vpop.f32.mrf.mxu0 }
 0x10b   :  { %v418_v15 = vadd.f32 %v1105_v13, %v1741_v59 }
 0x10c   :  { %v1107_v16 = vpop.f32.mrf.mxu0 }
 0x10d   :  { %v518_v22 = vmax.f32 %v418_v15, 0.0  ;;  %v1108_v23 = vadd.f32 %v1107_v16, %v1106_v14 }
 0x10e   :  { %v1109_v38 = vpop.f32.mrf.mxu0 }
 0x10f   :  { %v545_v41 = vpack.c.bf16 %v518_v22, %v517_v21  ;;  %v423_v45 = vadd.f32 %v1108_v23, %v1741_v59 }
 0x110   :  { %v1110_v42 = vpop.f32.mrf.mxu0 }
 0x111   :  { %v1111_v46 = vadd.f32 %v1110_v42, %v1109_v38  ;;  %1332 = vmatprep.mubr.bf16.mxu0 %v545_v41  ;;  %v519_v60 = vmax.f32 %v423_v45, 0.0 }
 0x112   :  { %v1112_v56 = vpop.f32.mrf.mxu0 }
 0x113   :  { %v426_v57 = vadd.f32 %v1111_v46, %v1741_v59 }
 0x114   :  { %v1113_v58 = vpop.f32.mrf.mxu0 }
 0x115   :  { %v520_v61 = vmax.f32 %v426_v57, 0.0  ;;  %v1114_v62 = vadd.f32 %v1113_v58, %v1112_v56 }
 0x116   :  { %v1115_v63 = vpop.f32.mrf.mxu0 }
 0x117   :  { %v546_v0 = vpack.c.bf16 %v520_v61, %v519_v60  ;;  %v431_v2 = vadd.f32 %v1114_v62, %v1741_v59 }
 0x118   :  { %v1116_v1 = vpop.f32.mrf.mxu0 }
 0x119   :  { %v1117_v3 = vadd.f32 %v1116_v1, %v1115_v63  ;;  %1333 = vmatmul.mubr.bf16.gmra.mxu0 %v546_v0  ;;  %v521_v7 = vmax.f32 %v431_v2, 0.0 }
 0x11a   :  { %v1118_v4 = vpop.f32.mrf.mxu0 }
 0x11b   :  { %v434_v5 = vadd.f32 %v1117_v3, %v1741_v59 }
 0x11c   :  { %v1119_v6 = vpop.f32.mrf.mxu0 }
 0x11d   :  { %v522_v8 = vmax.f32 %v434_v5, 0.0  ;;  %v1120_v9 = vadd.f32 %v1119_v6, %v1118_v4 }
 0x11e   :  { %v1121_v10 = vpop.f32.mrf.mxu0 }
 0x11f   :  { %v547_v12 = vpack.c.bf16 %v522_v8, %v521_v7  ;;  %v439_v14 = vadd.f32 %v1120_v9, %v1741_v59 }
 0x120   :  { %v1122_v13 = vpop.f32.mrf.mxu0 }
 0x121   :  { %v1123_v15 = vadd.f32 %v1122_v13, %v1121_v10  ;;  %1336 = vmatprep.mubr.bf16.mxu0 %v547_v12  ;;  %v523_v23 = vmax.f32 %v439_v14, 0.0 }
 0x122   :  { %v1124_v16 = vpop.f32.mrf.mxu0 }
 0x123   :  { %v442_v21 = vadd.f32 %v1123_v15, %v1741_v59 }
 0x124   :  { %v1125_v22 = vpop.f32.mrf.mxu0 }
 0x125   :  { %v524_v38 = vmax.f32 %v442_v21, 0.0  ;;  %v1126_v41 = vadd.f32 %v1125_v22, %v1124_v16 }
 0x126   :  { %v1127_v42 = vpop.f32.mrf.mxu0 }
 0x127   :  { %v548_v45 = vpack.c.bf16 %v524_v38, %v523_v23  ;;  %v447_v57 = vadd.f32 %v1126_v41, %v1741_v59 }
 0x128   :  { %v1128_v46 = vpop.f32.mrf.mxu0 }
 0x129   :  { %v1129_v56 = vadd.f32 %v1128_v46, %v1127_v42  ;;  %1337 = vmatmul.mubr.bf16.gmra.mxu0 %v548_v45  ;;  %v525_v63 = vmax.f32 %v447_v57, 0.0 }
 0x12a   :  { %v1130_v58 = vpop.f32.mrf.mxu0 }
 0x12b   :  { %v450_v60 = vadd.f32 %v1129_v56, %v1741_v59 }
 0x12c   :  { %v1131_v61 = vpop.f32.mrf.mxu0 }
 0x12d   :  { %v1132_v62 = vadd.f32 %v1131_v61, %v1130_v58  ;;  %v526_v0 = vmax.f32 %v450_v60, 0.0 }
 0x12e   :  { %v1133_v1 = vpop.f32.mrf.mxu0 }
 0x12f   :  { %v549_v2 = vpack.c.bf16 %v526_v0, %v525_v63  ;;  %v455_v4 = vadd.f32 %v1132_v62, %v1741_v59 }
 0x130   :  { %v1134_v3 = vpop.f32.mrf.mxu0 }
 0x131   :  { %v1135_v5 = vadd.f32 %v1134_v3, %v1133_v1  ;;  %1340 = vmatprep.mubr.bf16.mxu1 %v549_v2  ;;  %v527_v9 = vmax.f32 %v455_v4, 0.0 }
 0x132   :  { %v1136_v6 = vpop.f32.mrf.mxu0 }
 0x133   :  { %v458_v7 = vadd.f32 %v1135_v5, %v1741_v59 }
 0x134   :  { %v1137_v8 = vpop.f32.mrf.mxu0 }
 0x135   :  { %v528_v10 = vmax.f32 %v458_v7, 0.0  ;;  %v1138_v12 = vadd.f32 %v1137_v8, %v1136_v6 }
 0x136   :  { %v1139_v13 = vpop.f32.mrf.mxu0 }
 0x137   :  { %v550_v14 = vpack.c.bf16 %v528_v10, %v527_v9  ;;  %v463_v16 = vadd.f32 %v1138_v12, %v1741_v59 }
 0x138   :  { %v1140_v15 = vpop.f32.mrf.mxu0 }
 0x139   :  { %v1141_v21 = vadd.f32 %v1140_v15, %v1139_v13  ;;  %1341 = vmatmul.mubr.bf16.vlgmr.msra.gmra.mxu1 %v550_v14  ;;  %v529_v41 = vmax.f32 %v463_v16, 0.0 }
 0x13a   :  { %v1142_v22 = vpop.f32.mrf.mxu0 }
 0x13b   :  { %v466_v23 = vadd.f32 %v1141_v21, %v1741_v59 }
 0x13c   :  { %v1143_v38 = vpop.f32.mrf.mxu0 }
 0x13d   :  { %v530_v42 = vmax.f32 %v466_v23, 0.0  ;;  %v1144_v45 = vadd.f32 %v1143_v38, %v1142_v22 }
 0x13e   :  { %v1145_v46 = vpop.f32.mrf.mxu0 }
 0x13f   :  { %v551_v56 = vpack.c.bf16 %v530_v42, %v529_v41  ;;  %v471_v58 = vadd.f32 %v1144_v45, %v1741_v59 }
 0x140   :  { %v1146_v57 = vpop.f32.mrf.mxu0 }
 0x141   :  { %v1147_v60 = vadd.f32 %v1146_v57, %v1145_v46  ;;  %1344 = vmatprep.mubr.bf16.mxu1 %v551_v56  ;;  %v531_v0 = vmax.f32 %v471_v58, 0.0 }
 0x142   :  { %v1148_v61 = vpop.f32.mrf.mxu0 }
 0x143   :  { %v474_v62 = vadd.f32 %v1147_v60, %v1741_v59 }
 0x144   :  { %v1149_v63 = vpop.f32.mrf.mxu0 }
 0x145   :  { %v532_v1 = vmax.f32 %v474_v62, 0.0  ;;  %v1150_v2 = vadd.f32 %v1149_v63, %v1148_v61 }
 0x146   :  { %v1151_v3 = vpop.f32.mrf.mxu0 }
 0x147   :  { %v552_v4 = vpack.c.bf16 %v532_v1, %v531_v0  ;;  %v479_v6 = vadd.f32 %v1150_v2, %v1741_v59 }
 0x148   :  { %v1152_v5 = vpop.f32.mrf.mxu0 }
 0x149   :  { %v1153_v7 = vadd.f32 %v1152_v5, %v1151_v3  ;;  %1345 = vmatmul.mubr.bf16.gmra.mxu1 %v552_v4  ;;  %v533_v12 = vmax.f32 %v479_v6, 0.0 }
 0x14a   :  { %v1154_v8 = vpop.f32.mrf.mxu0 }
 0x14b   :  { %v482_v9 = vadd.f32 %v1153_v7, %v1741_v59 }
 0x14c   :  { %v1155_v10 = vpop.f32.mrf.mxu0 }
 0x14d   :  { %v534_v13 = vmax.f32 %v482_v9, 0.0  ;;  %v1156_v14 = vadd.f32 %v1155_v10, %v1154_v8 }
 0x14e   :  { %v1157_v15 = vpop.f32.mrf.mxu0 }
 0x14f   :  { %v553_v16 = vpack.c.bf16 %v534_v13, %v533_v12  ;;  %v487_v22 = vadd.f32 %v1156_v14, %v1741_v59 }
 0x150   :  { %v1158_v21 = vpop.f32.mrf.mxu0 }
 0x151   :  { %v1159_v23 = vadd.f32 %v1158_v21, %v1157_v15  ;;  %1348 = vmatprep.mubr.bf16.mxu1 %v553_v16  ;;  %v535_v45 = vmax.f32 %v487_v22, 0.0 }
 0x152   :  { %v1160_v38 = vpop.f32.mrf.mxu0 }
 0x153   :  { %v490_v41 = vadd.f32 %v1159_v23, %v1741_v59 }
 0x154   :  { %v1161_v42 = vpop.f32.mrf.mxu0 }
 0x155   :  { %v536_v46 = vmax.f32 %v490_v41, 0.0  ;;  %v1162_v56 = vadd.f32 %v1161_v42, %v1160_v38 }
 0x156   :  { %v1163_v57 = vpop.f32.mrf.mxu0 }
 0x157   :  { %v554_v58 = vpack.c.bf16 %v536_v46, %v535_v45  ;;  %v495_v61 = vadd.f32 %v1162_v56, %v1741_v59 }
 0x158   :  { %v1164_v60 = vpop.f32.mrf.mxu0 }
 0x159   :  { %v1165_v62 = vadd.f32 %v1164_v60, %v1163_v57  ;;  %1349 = vmatmul.mubr.bf16.gmra.mxu1 %v554_v58  ;;  %v537_v2 = vmax.f32 %v495_v61, 0.0 }
 0x15a   :  { %v1166_v63 = vpop.f32.mrf.mxu0 }
 0x15b   :  { %v498_v0 = vadd.f32 %v1165_v62, %v1741_v59 }
 0x15c   :  { %v1167_v1 = vpop.f32.mrf.mxu0 }
 0x15d   :  { %v538_v3 = vmax.f32 %v498_v0, 0.0  ;;  %v1168_v4 = vadd.f32 %v1167_v1, %v1166_v63 }
 0x15e   :  { %v1169_v5 = vpop.f32.mrf.mxu0 }
 0x15f   :  { %v555_v6 = vpack.c.bf16 %v538_v3, %v537_v2  ;;  %v503_v8 = vadd.f32 %v1168_v4, %v1741_v59 }
 0x160   :  { %v1170_v7 = vpop.f32.mrf.mxu0 }
 0x161   :  { %v1171_v9 = vadd.f32 %v1170_v7, %v1169_v5  ;;  %1352 = vmatprep.mubr.bf16.mxu1 %v555_v6  ;;  %v539_v12 = vmax.f32 %v503_v8, 0.0 }
 0x163   :  { %v506_v10 = vadd.f32 %v1171_v9, %v1741_v59 }
 0x165   :  { %v540_v13 = vmax.f32 %v506_v10, 0.0 }
 0x167   :  { %v556_v14 = vpack.c.bf16 %v540_v13, %v539_v12 }
 0x169   :  { %1353 = vmatmul.mubr.bf16.gmra.mxu1 %v556_v14 }
 0x16a   :  { %837 = vmatprep.mubr.bf16.mxu1 %v1510_v11 }
 0x1b9   :  { %v1326_v15 = vpop.f32.mrf.mxu0 }
 0x1bb   :  { %v655_v16 = vpop.f32.mrf.mxu0 }
 0x1bd   :  { %v1327_v22 = vpop.f32.mrf.mxu0 }
 0x1bf   :  { %v658_v38 = vpop.f32.mrf.mxu0 }
 0x1c9   :  { %v1330_v42 = vpop.f32.mrf.mxu0 }
 0x1cb   :  { %v671_v46 = vpop.f32.mrf.mxu0 }
 0x1cd   :  { %v1331_v57 = vpop.f32.mrf.mxu0 }
 0x1cf   :  { %v674_v59 = vpop.f32.mrf.mxu0 }
 0x1d9   :  { %v1334_v61 = vpop.f32.mrf.mxu0 }
 0x1db   :  { %v687_v63 = vpop.f32.mrf.mxu0 }
 0x1dd   :  { %v1335_v11 = vpop.f32.mrf.mxu0 }
 0x1de   :  { %v787_v51 = vpack.c.bf16 %v1335_v11, %v1334_v61 }
 0x1df   :  { %v690_v2 = vpop.f32.mrf.mxu0 }
 0x1e0   :  { %v786_v49 = vpack.c.bf16 %v690_v2, %v687_v63 }
 0x1e9   :  { %v1338_v4 = vpop.f32.mrf.mxu0 }
 0x1eb   :  { %v703_v6 = vpop.f32.mrf.mxu0 }
 0x1ed   :  { %v1339_v9 = vpop.f32.mrf.mxu0 }
 0x1ee   :  { %v789_v13 = vpack.c.bf16 %v1339_v9, %v1338_v4 }
 0x1ef   :  { %v706_v55 = vpop.f32.mrf.mxu0 }
 0x1f0   :  { %v788_v53 = vpack.c.bf16 %v706_v55, %v703_v6 }
 0x1f9   :  { %v1342_v21 = vpop.f32.mrf.mxu1 }
 0x1fb   :  { %v719_v23 = vpop.f32.mrf.mxu1 }
 0x1fd   :  { %v1343_v41 = vpop.f32.mrf.mxu1 }
 0x1fe   :  { %v791_v9 = vpack.c.bf16 %v1343_v41, %v1342_v21 }
 0x1ff   :  { %v722_v45 = vpop.f32.mrf.mxu1 }
 0x200   :  { %v790_v55 = vpack.c.bf16 %v722_v45, %v719_v23 }
 0x209   :  { %v1346_v56 = vpop.f32.mrf.mxu1 }
 0x20b   :  { %v735_v58 = vpop.f32.mrf.mxu1 }
 0x20d   :  { %v1347_v60 = vpop.f32.mrf.mxu1 }
 0x20e   :  { %v793_v48 = vpack.c.bf16 %v1347_v60, %v1346_v56 }
 0x20f   :  { %v738_v62 = vpop.f32.mrf.mxu1 }
 0x210   :  { %v792_v4 = vpack.c.bf16 %v738_v62, %v735_v58 }
 0x219   :  { %v1350_v0 = vpop.f32.mrf.mxu1 }
 0x21b   :  { %v751_v1 = vpop.f32.mrf.mxu1 }
 0x21d   :  { %v1351_v3 = vpop.f32.mrf.mxu1 }
 0x21e   :  { %v795_v52 = vpack.c.bf16 %v1351_v3, %v1350_v0 }
 0x21f   :  { %v754_v5 = vpop.f32.mrf.mxu1 }
 0x220   :  { %v794_v50 = vpack.c.bf16 %v754_v5, %v751_v1 }
 0x229   :  { %v1354_v7 = vpop.f32.mrf.mxu1 }
 0x22b   :  { %v767_v8 = vpop.f32.mrf.mxu1 }
 0x22d   :  { %v1355_v10 = vpop.f32.mrf.mxu1 }
 0x22e   :  { %v797_v12 = vpack.c.bf16 %v1355_v10, %v1354_v7  ;;  %v785_v7 = vpack.c.bf16 %v1331_v57, %v1330_v42 }
 0x22f   :  { %v770_v14 = vpop.f32.mrf.mxu1 }
 0x230   :  { %v796_v54 = vpack.c.bf16 %v770_v14, %v767_v8  ;;  %1196 = vmatprep.subr.bf16.mxu1 %v797_v12  ;;  %v784_v8 = vpack.c.bf16 %v674_v59, %v671_v46 }
 0x231   :  { %1197 = vmatpush3.bf16.msra.mxu1 %v789_v13 }
 0x232   :  { %1198 = vmatprep.subr.bf16.mxu1 %v796_v54  ;;  %v783_v54 = vpack.c.bf16 %v1327_v22, %v1326_v15 }
 0x235   :  { %1199 = vmatpush3.bf16.msra.mxu1 %v788_v53 }
 0x236   :  { %1200 = vmatprep.subr.bf16.mxu1 %v795_v52  ;;  %v782_v52 = vpack.c.bf16 %v658_v38, %v655_v16 }
 0x239   :  { %1201 = vmatpush3.bf16.msra.mxu1 %v787_v51 }
 0x23a   :  { %1202 = vmatprep.subr.bf16.mxu1 %v794_v50 }
 0x23d   :  { %1203 = vmatpush3.bf16.msra.mxu1 %v786_v49 }
 0x23e   :  { %1204 = vmatprep.subr.bf16.mxu1 %v793_v48 }
 0x241   :  { %1205 = vmatpush3.bf16.msra.mxu1 %v785_v7 }
 0x242   :  { %1206 = vmatprep.subr.bf16.mxu1 %v792_v4 }
 0x245   :  { %1207 = vmatpush3.bf16.msra.mxu1 %v784_v8 }
 0x246   :  { %1208 = vmatprep.subr.bf16.mxu1 %v791_v9 }
 0x249   :  { %1209 = vmatpush3.bf16.msra.mxu1 %v783_v54 }
 0x24a   :  { %1210 = vmatprep.subr.bf16.mxu1 %v790_v55 }
 0x24d   :  { %1211 = vmatpush3.bf16.msra.mxu1 %v782_v52 }
 0x250   :  { %838 = vmatmul.mubr.bf16.vlgmr.msra.gmra.mxu1 %v1531_v17  ;;  %v1962_v17 = vld [vmem:[#allocation2_spill] sm:$0xff] }
 0x251   :  { %845 = vmatprep.mubr.bf16.mxu1 %v1536_v18  ;;  %v1963_v18 = vld [vmem:[#allocation3_spill] sm:$0xff] }
 0x258   :  { %846 = vmatmul.mubr.bf16.gmra.mxu1 %v1543_v19  ;;  %v1964_v19 = vld [vmem:[#allocation4_spill] sm:$0xff] }
 0x259   :  { %853 = vmatprep.mubr.bf16.mxu1 %v1548_v20  ;;  %v1965_v20 = vld [vmem:[#allocation5_spill] sm:$0xff] }
 0x260   :  { %854 = vmatmul.mubr.bf16.gmra.mxu1 %v1564_v24  ;;  %v1966_v24 = vld [vmem:[#allocation6_spill] sm:$0xff] }
 0x261   :  { %861 = vmatprep.mubr.bf16.mxu1 %v1569_v25  ;;  %v1967_v25 = vld [vmem:[#allocation7_spill] sm:$0xff] }
 0x268   :  { %862 = vmatmul.mubr.bf16.gmra.mxu1 %v1576_v26  ;;  %v1968_v26 = vld [vmem:[#allocation8_spill] sm:$0xff] }
 0x269   :  { %869 = vmatprep.mubr.bf16.mxu1 %v1581_v27  ;;  %v1969_v27 = vld [vmem:[#allocation9_spill] sm:$0xff] }
 0x270   :  { %870 = vmatmul.mubr.bf16.gmra.mxu1 %v1588_v28 }
 0x271   :  { %877 = vmatprep.mubr.bf16.mxu1 %v1593_v29  ;;  %v1810_v29 = vld [vmem:[%s1944_s4] ss:$0 sm:$0xff] }
 0x278   :  { %878 = vmatmul.mubr.bf16.gmra.mxu1 %v1600_v30 }
 0x279   :  { %885 = vmatprep.mubr.bf16.mxu1 %v1605_v31 }
 0x280   :  { %886 = vmatmul.mubr.bf16.gmra.mxu1 %v1612_v32 }
 0x281   :  { %893 = vmatprep.mubr.bf16.mxu1 %v1617_v33 }
 0x288   :  { %894 = vmatmul.mubr.bf16.gmra.mxu1 %v1624_v34 }
 0x289   :  { %901 = vmatprep.mubr.bf16.mxu1 %v1629_v35 }
 0x290   :  { %902 = vmatmul.mubr.bf16.gmra.mxu1 %v1636_v36 }
 0x291   :  { %909 = vmatprep.mubr.bf16.mxu1 %v1641_v37 }
 0x298   :  { %910 = vmatmul.mubr.bf16.gmra.mxu1 %v1651_v39 }
 0x299   :  { %917 = vmatprep.mubr.bf16.mxu1 %v1656_v40 }
 0x2a0   :  { %918 = vmatmul.mubr.bf16.gmra.mxu1 %v1669_v43 }
 0x2a1   :  { %925 = vmatprep.mubr.bf16.mxu1 %v1674_v44 }
 0x2a8   :  { %926 = vmatmul.mubr.bf16.gmra.mxu1 %v1687_v47 }
 0x2a9   :  { %933 = vmatprep.mubr.bf16.mxu1 %v1962_v17 }
 0x2b0   :  { %934 = vmatmul.mubr.bf16.gmra.mxu1 %v1963_v18 }
 0x2b1   :  { %941 = vmatprep.mubr.bf16.mxu1 %v1964_v19 }
 0x2b8   :  { %942 = vmatmul.mubr.bf16.gmra.mxu1 %v1965_v20 }
 0x2b9   :  { %949 = vmatprep.mubr.bf16.mxu1 %v1966_v24 }
 0x2c0   :  { %950 = vmatmul.mubr.bf16.gmra.mxu1 %v1967_v25 }
 0x2c1   :  { %957 = vmatprep.mubr.bf16.mxu1 %v1968_v26 }
 0x2c8   :  { %958 = vmatmul.mubr.bf16.gmra.mxu1 %v1969_v27 }
 0x310   :  { %v1212_v28 = vpop.f32.mrf.mxu1 }
 0x312   :  { %v1213_v30 = vpop.f32.mrf.mxu1 }
 0x313   :  { %v1214_v31 = vadd.f32 %v1213_v30, %v1212_v28 }
 0x314   :  { %v1215_v32 = vpop.f32.mrf.mxu1 }
 0x315   :  { %v840_v33 = vadd.f32 %v1214_v31, %v1810_v29 }
 0x316   :  { %v1216_v34 = vpop.f32.mrf.mxu1 }
 0x317   :  { %966 = vst [vmem:[%s1945_s5] sm:$0xff] %v840_v33  ;;  %v1217_v35 = vadd.f32 %v1216_v34, %v1215_v32 }
 0x318   :  { %v1218_v36 = vpop.f32.mrf.mxu1 }
 0x319   :  { %v843_v37 = vadd.f32 %v1217_v35, %v1810_v29 }
 0x31a   :  { %v1219_v39 = vpop.f32.mrf.mxu1 }
 0x31b   :  { %967 = vst [vmem:[%s1945_s5 + $0x8] sm:$0xff] %v843_v37  ;;  %v1220_v40 = vadd.f32 %v1219_v39, %v1218_v36 }
 0x31c   :  { %v1221_v43 = vpop.f32.mrf.mxu1 }
 0x31d   :  { %v848_v44 = vadd.f32 %v1220_v40, %v1810_v29 }
 0x31e   :  { %v1222_v47 = vpop.f32.mrf.mxu1 }
 0x31f   :  { %968 = vst [vmem:[%s1945_s5 + $0x10] sm:$0xff] %v848_v44  ;;  %v1223_v48 = vadd.f32 %v1222_v47, %v1221_v43 }
 0x320   :  { %v1224_v49 = vpop.f32.mrf.mxu1 }
 0x321   :  { %v851_v50 = vadd.f32 %v1223_v48, %v1810_v29 }
 0x322   :  { %v1225_v51 = vpop.f32.mrf.mxu1 }
 0x323   :  { %969 = vst [vmem:[%s1945_s5 + $0x18] sm:$0xff] %v851_v50  ;;  %v1226_v53 = vadd.f32 %v1225_v51, %v1224_v49 }
 0x324   :  { %v1227_v15 = vpop.f32.mrf.mxu1 }
 0x325   :  { %v856_v16 = vadd.f32 %v1226_v53, %v1810_v29 }
 0x326   :  { %v1228_v21 = vpop.f32.mrf.mxu1 }
 0x327   :  { %970 = vst [vmem:[%s1945_s5 + $0x20] sm:$0xff] %v856_v16  ;;  %v1229_v22 = vadd.f32 %v1228_v21, %v1227_v15 }
 0x328   :  { %v1230_v23 = vpop.f32.mrf.mxu1 }
 0x329   :  { %v859_v38 = vadd.f32 %v1229_v22, %v1810_v29 }
 0x32a   :  { %v1231_v41 = vpop.f32.mrf.mxu1 }
 0x32b   :  { %971 = vst [vmem:[%s1945_s5 + $0x28] sm:$0xff] %v859_v38  ;;  %v1232_v42 = vadd.f32 %v1231_v41, %v1230_v23 }
 0x32c   :  { %v1233_v45 = vpop.f32.mrf.mxu1 }
 0x32d   :  { %v864_v46 = vadd.f32 %v1232_v42, %v1810_v29 }
 0x32e   :  { %v1234_v56 = vpop.f32.mrf.mxu1 }
 0x32f   :  { %972 = vst [vmem:[%s1945_s5 + $0x30] sm:$0xff] %v864_v46  ;;  %v1235_v57 = vadd.f32 %v1234_v56, %v1233_v45 }
 0x330   :  { %v1236_v58 = vpop.f32.mrf.mxu1 }
 0x331   :  { %v867_v59 = vadd.f32 %v1235_v57, %v1810_v29 }
 0x332   :  { %v1237_v60 = vpop.f32.mrf.mxu1 }
 0x333   :  { %973 = vst [vmem:[%s1945_s5 + $0x38] sm:$0xff] %v867_v59  ;;  %v1238_v61 = vadd.f32 %v1237_v60, %v1236_v58 }
 0x334   :  { %v1239_v62 = vpop.f32.mrf.mxu1 }
 0x335   :  { %v872_v63 = vadd.f32 %v1238_v61, %v1810_v29 }
 0x336   :  { %v1240_v0 = vpop.f32.mrf.mxu1 }
 0x337   :  { %974 = vst [vmem:[%s1945_s5 + $0x40] sm:$0xff] %v872_v63  ;;  %v1241_v11 = vadd.f32 %v1240_v0, %v1239_v62 }
 0x338   :  { %v1242_v1 = vpop.f32.mrf.mxu1 }
 0x339   :  { %v875_v2 = vadd.f32 %v1241_v11, %v1810_v29 }
 0x33a   :  { %v1243_v3 = vpop.f32.mrf.mxu1 }
 0x33b   :  { %975 = vst [vmem:[%s1945_s5 + $0x48] sm:$0xff] %v875_v2  ;;  %v1244_v5 = vadd.f32 %v1243_v3, %v1242_v1 }
 0x33c   :  { %v1245_v6 = vpop.f32.mrf.mxu1 }
 0x33d   :  { %v880_v10 = vadd.f32 %v1244_v5, %v1810_v29 }
 0x33e   :  { %v1246_v12 = vpop.f32.mrf.mxu1 }
 0x33f   :  { %976 = vst [vmem:[%s1945_s5 + $0x50] sm:$0xff] %v880_v10  ;;  %v1247_v13 = vadd.f32 %v1246_v12, %v1245_v6 }
 0x340   :  { %v1248_v14 = vpop.f32.mrf.mxu1 }
 0x341   :  { %v883_v7 = vadd.f32 %v1247_v13, %v1810_v29 }
 0x342   :  { %v1249_v4 = vpop.f32.mrf.mxu1 }
 0x343   :  { %977 = vst [vmem:[%s1945_s5 + $0x58] sm:$0xff] %v883_v7  ;;  %v1250_v8 = vadd.f32 %v1249_v4, %v1248_v14 }
 0x344   :  { %v1251_v9 = vpop.f32.mrf.mxu1 }
 0x345   :  { %v888_v54 = vadd.f32 %v1250_v8, %v1810_v29 }
 0x346   :  { %v1252_v55 = vpop.f32.mrf.mxu1 }
 0x347   :  { %978 = vst [vmem:[%s1945_s5 + $0x60] sm:$0xff] %v888_v54  ;;  %v1253_v52 = vadd.f32 %v1252_v55, %v1251_v9 }
 0x348   :  { %v1254_v17 = vpop.f32.mrf.mxu1 }
 0x349   :  { %v891_v18 = vadd.f32 %v1253_v52, %v1810_v29 }
 0x34a   :  { %v1255_v19 = vpop.f32.mrf.mxu1 }
 0x34b   :  { %979 = vst [vmem:[%s1945_s5 + $0x68] sm:$0xff] %v891_v18  ;;  %v1256_v20 = vadd.f32 %v1255_v19, %v1254_v17 }
 0x34c   :  { %v1257_v24 = vpop.f32.mrf.mxu1 }
 0x34d   :  { %v896_v25 = vadd.f32 %v1256_v20, %v1810_v29 }
 0x34e   :  { %v1258_v26 = vpop.f32.mrf.mxu1 }
 0x34f   :  { %980 = vst [vmem:[%s1945_s5 + $0x70] sm:$0xff] %v896_v25  ;;  %v1259_v27 = vadd.f32 %v1258_v26, %v1257_v24 }
 0x350   :  { %v1260_v28 = vpop.f32.mrf.mxu1 }
 0x351   :  { %v899_v30 = vadd.f32 %v1259_v27, %v1810_v29 }
 0x352   :  { %v1261_v31 = vpop.f32.mrf.mxu1 }
 0x353   :  { %981 = vst [vmem:[%s1945_s5 + $0x78] sm:$0xff] %v899_v30  ;;  %v1262_v32 = vadd.f32 %v1261_v31, %v1260_v28 }
 0x354   :  { %v1263_v33 = vpop.f32.mrf.mxu1 }
 0x355   :  { %v904_v34 = vadd.f32 %v1262_v32, %v1810_v29 }
 0x356   :  { %v1264_v35 = vpop.f32.mrf.mxu1 }
 0x357   :  { %982 = vst [vmem:[%s1945_s5 + $0x80] sm:$0xff] %v904_v34  ;;  %v1265_v36 = vadd.f32 %v1264_v35, %v1263_v33 }
 0x358   :  { %v1266_v37 = vpop.f32.mrf.mxu1 }
 0x359   :  { %v907_v39 = vadd.f32 %v1265_v36, %v1810_v29 }
 0x35a   :  { %v1267_v40 = vpop.f32.mrf.mxu1 }
 0x35b   :  { %983 = vst [vmem:[%s1945_s5 + $0x88] sm:$0xff] %v907_v39  ;;  %v1268_v43 = vadd.f32 %v1267_v40, %v1266_v37 }
 0x35c   :  { %v1269_v44 = vpop.f32.mrf.mxu1 }
 0x35d   :  { %v912_v47 = vadd.f32 %v1268_v43, %v1810_v29 }
 0x35e   :  { %v1270_v48 = vpop.f32.mrf.mxu1 }
 0x35f   :  { %984 = vst [vmem:[%s1945_s5 + $0x90] sm:$0xff] %v912_v47  ;;  %v1271_v49 = vadd.f32 %v1270_v48, %v1269_v44 }
 0x360   :  { %v1272_v50 = vpop.f32.mrf.mxu1 }
 0x361   :  { %v915_v51 = vadd.f32 %v1271_v49, %v1810_v29 }
 0x362   :  { %v1273_v53 = vpop.f32.mrf.mxu1 }
 0x363   :  { %985 = vst [vmem:[%s1945_s5 + $0x98] sm:$0xff] %v915_v51  ;;  %v1274_v15 = vadd.f32 %v1273_v53, %v1272_v50 }
 0x364   :  { %v1275_v16 = vpop.f32.mrf.mxu1 }
 0x365   :  { %v920_v21 = vadd.f32 %v1274_v15, %v1810_v29 }
 0x366   :  { %v1276_v22 = vpop.f32.mrf.mxu1 }
 0x367   :  { %986 = vst [vmem:[%s1945_s5 + $0xa0] sm:$0xff] %v920_v21  ;;  %v1277_v23 = vadd.f32 %v1276_v22, %v1275_v16 }
 0x368   :  { %v1278_v38 = vpop.f32.mrf.mxu1 }
 0x369   :  { %v923_v41 = vadd.f32 %v1277_v23, %v1810_v29 }
 0x36a   :  { %v1279_v42 = vpop.f32.mrf.mxu1 }
 0x36b   :  { %987 = vst [vmem:[%s1945_s5 + $0xa8] sm:$0xff] %v923_v41  ;;  %v1280_v45 = vadd.f32 %v1279_v42, %v1278_v38 }
 0x36c   :  { %v1281_v46 = vpop.f32.mrf.mxu1 }
 0x36d   :  { %v928_v56 = vadd.f32 %v1280_v45, %v1810_v29 }
 0x36e   :  { %v1282_v57 = vpop.f32.mrf.mxu1 }
 0x36f   :  { %988 = vst [vmem:[%s1945_s5 + $0xb0] sm:$0xff] %v928_v56  ;;  %v1283_v58 = vadd.f32 %v1282_v57, %v1281_v46 }
 0x370   :  { %v1284_v59 = vpop.f32.mrf.mxu1 }
 0x371   :  { %v931_v60 = vadd.f32 %v1283_v58, %v1810_v29 }
 0x372   :  { %v1285_v61 = vpop.f32.mrf.mxu1 }
 0x373   :  { %989 = vst [vmem:[%s1945_s5 + $0xb8] sm:$0xff] %v931_v60  ;;  %v1286_v62 = vadd.f32 %v1285_v61, %v1284_v59 }
 0x374   :  { %v1287_v63 = vpop.f32.mrf.mxu1 }
 0x375   :  { %v936_v0 = vadd.f32 %v1286_v62, %v1810_v29 }
 0x376   :  { %v1288_v11 = vpop.f32.mrf.mxu1 }
 0x377   :  { %990 = vst [vmem:[%s1945_s5 + $0xc0] sm:$0xff] %v936_v0  ;;  %v1289_v1 = vadd.f32 %v1288_v11, %v1287_v63 }
 0x378   :  { %v1290_v2 = vpop.f32.mrf.mxu1 }
 0x379   :  { %v939_v3 = vadd.f32 %v1289_v1, %v1810_v29 }
 0x37a   :  { %v1291_v5 = vpop.f32.mrf.mxu1 }
 0x37b   :  { %991 = vst [vmem:[%s1945_s5 + $0xc8] sm:$0xff] %v939_v3  ;;  %v1292_v6 = vadd.f32 %v1291_v5, %v1290_v2 }
 0x37c   :  { %v1293_v10 = vpop.f32.mrf.mxu1 }
 0x37d   :  { %v944_v12 = vadd.f32 %v1292_v6, %v1810_v29 }
 0x37e   :  { %v1294_v13 = vpop.f32.mrf.mxu1 }
 0x37f   :  { %992 = vst [vmem:[%s1945_s5 + $0xd0] sm:$0xff] %v944_v12  ;;  %v1295_v14 = vadd.f32 %v1294_v13, %v1293_v10 }
 0x380   :  { %v1296_v7 = vpop.f32.mrf.mxu1 }
 0x381   :  { %v947_v4 = vadd.f32 %v1295_v14, %v1810_v29 }
 0x382   :  { %v1297_v8 = vpop.f32.mrf.mxu1 }
 0x383   :  { %993 = vst [vmem:[%s1945_s5 + $0xd8] sm:$0xff] %v947_v4  ;;  %v1298_v9 = vadd.f32 %v1297_v8, %v1296_v7 }
 0x384   :  { %v1299_v54 = vpop.f32.mrf.mxu1 }
 0x385   :  { %v952_v55 = vadd.f32 %v1298_v9, %v1810_v29 }
 0x386   :  { %v1300_v52 = vpop.f32.mrf.mxu1 }
 0x387   :  { %994 = vst [vmem:[%s1945_s5 + $0xe0] sm:$0xff] %v952_v55  ;;  %v1301_v17 = vadd.f32 %v1300_v52, %v1299_v54 }
 0x388   :  { %v1302_v18 = vpop.f32.mrf.mxu1 }
 0x389   :  { %v955_v19 = vadd.f32 %v1301_v17, %v1810_v29 }
 0x38a   :  { %v1303_v20 = vpop.f32.mrf.mxu1 }
 0x38b   :  { %995 = vst [vmem:[%s1945_s5 + $0xe8] sm:$0xff] %v955_v19  ;;  %v1304_v24 = vadd.f32 %v1303_v20, %v1302_v18 }
 0x38c   :  { %v1305_v25 = vpop.f32.mrf.mxu1 }
 0x38d   :  { %v960_v26 = vadd.f32 %v1304_v24, %v1810_v29 }
 0x38e   :  { %v1306_v27 = vpop.f32.mrf.mxu1 }
 0x38f   :  { %996 = vst [vmem:[%s1945_s5 + $0xf0] sm:$0xff] %v960_v26  ;;  %v1307_v28 = vadd.f32 %v1306_v27, %v1305_v25 }
 0x391   :  { %v963_v30 = vadd.f32 %v1307_v28, %v1810_v29 }
 0x393   :  { %997 = vst [vmem:[%s1945_s5 + $0xf8] sm:$0xff] %v963_v30 }

</bundles_post_ra>
